<compile_context>
chip_gen: v6e
topology: v6e:2x2x1
jax: 0.10.0
libtpu: 0.0.40
codegen_flags: <defaults>
</compile_context>

<pallas_src>
import functools

import jax
import jax.numpy as jnp
from jax import lax
from jax.experimental import pallas as pl
from jax.experimental.pallas import tpu as pltpu

GAMMA = 2.0
ALPHA = 0.25

_LANE = 128
_MIB = 1024 * 1024


def _per_row_focal(logits, labels, gamma):
    """Per-row focal contribution w * logpt (before the -alpha/N scale).

    logits: (TN, C) f32, labels: (TN, 1) i32  ->  (TN, 1) f32
    """
    m = jnp.max(logits, axis=-1, keepdims=True)                    # (TN, 1)
    z = logits - m                                                  # (TN, C)
    log_z = jnp.log(jnp.sum(jnp.exp(z), axis=-1, keepdims=True))    # (TN, 1)

    # Gather z at the label lane without materializing full log_probs.
    cls_idx = lax.broadcasted_iota(jnp.int32, logits.shape, 1)      # (TN, C)
    z_t = jnp.sum(jnp.where(cls_idx == labels, z, 0.0),
                  axis=-1, keepdims=True)                           # (TN, 1)

    logpt = z_t - log_z                                             # (TN, 1)
    pt = jnp.exp(logpt)
    one_minus_pt = 1.0 - pt

    # Focal modulating factor: avoid float pow (EUP exp+log) when possible.
    if gamma == 2.0:
        w = one_minus_pt * one_minus_pt
    elif float(gamma).is_integer():
        w = lax.integer_pow(one_minus_pt, int(gamma))
    else:
        w = jnp.power(one_minus_pt, gamma)
    return w * logpt


def _focal_loss_kernel(emb_ref, lab_ref, psum_ref, *, scale, gamma, tile_n, rem):
    """One tile -> one (1,1) partial sum: scale * sum_i w_i * logpt_i.

    emb_ref : (tile_n, C) block in VMEM (native dtype)
    lab_ref : (tile_n, 1) int32 block in VMEM
    psum_ref: (1, 1) f32 block in SMEM (unique block per grid step, so the
              grid axis can stay 'parallel' -- no read-modify-write).
    rem     : number of valid rows in the LAST tile, or 0 if all tiles are
              full (decided statically in the wrapper).
    """
    logits = emb_ref[...].astype(jnp.float32)
    labels = lab_ref[...]

    if rem == 0:
        # No overhang anywhere: full tiles pay zero masking cost.
        psum_ref[0, 0] = scale * jnp.sum(_per_row_focal(logits, labels, gamma))
    else:
        i = pl.program_id(0)
        last = pl.num_programs(0) - 1

        @pl.when(i != last)
        def _full_tile():
            psum_ref[0, 0] = scale * jnp.sum(_per_row_focal(logits, labels, gamma))

        @pl.when(i == last)
        def _partial_tile():
            # Zero overhanging rows' logits before exp/log (no NaN/Inf from
            # unspecified VMEM), then drop their finite contributions.
            row_ok = lax.broadcasted_iota(jnp.int32, (tile_n, 1), 0) < rem
            safe_logits = jnp.where(row_ok, logits, 0.0)
            contrib = _per_row_focal(safe_logits, labels, gamma)
            psum_ref[0, 0] = scale * jnp.sum(jnp.where(row_ok, contrib, 0.0))


def focal_loss(embeddings, labels, *, gamma=GAMMA, alpha=ALPHA):
    """embeddings: (N, C) float; labels: (N,) int. Returns scalar f32 loss."""
    n, c = embeddings.shape
    if n == 0:
        # Define the mean over an empty batch as 0 (guards a divide-by-zero).
        return jnp.float32(0.0)
    labels2d = labels.astype(jnp.int32).reshape(n, 1)

    # --- VMEM budgeting ------------------------------------------------------
    try:
        vmem_cap = int(pltpu.get_tpu_info().vmem_capacity_bytes)
    except Exception:  # conservative fallback if the query is unavailable
        vmem_cap = 64 * _MIB
    # Scoped VMEM limit: half of physical, capped at 64 MiB
    # (v5e/v6e: 64 MiB; v7x with 64 MiB physical VMEM: 32 MiB).
    vmem_limit = int(min(vmem_cap // 2, 64 * _MIB))

    # Per-row VMEM footprint, accounting for 128-lane padding:
    #   * input block (double-buffered, native dtype, C rounded up to lanes)
    #   * labels block: (TN,1) int32 pads to 128 lanes, double-buffered
    #   * ~6 live f32 (TN, C)-sized temporaries inside the kernel body
    #   * ~8 narrow (TN,1) f32 temporaries, each padded to 128 lanes
    c_pad = -(-c // _LANE) * _LANE
    in_itemsize = jnp.dtype(embeddings.dtype).itemsize
    per_row_bytes = (2 * c_pad * in_itemsize
                     + 2 * _LANE * 4
                     + 6 * c_pad * 4
                     + 8 * _LANE * 4)

    def _rows_for(limit):
        t = (limit // 2) // per_row_bytes          # keep half the limit free
        return max(8, (t // 8) * 8)                # sublane multiple of 8

    tile_n = _rows_for(vmem_limit)
    # Only v7x's 32 MiB scoped limit with a very wide C can land the input
    # block under the ~2 MiB streaming knee; if so, spend more scoped VMEM
    # (toward 3/4 of physical) instead of shrinking the block.
    if tile_n * c * in_itemsize < 2 * _MIB:
        bigger = int(min((vmem_cap * 3) // 4, 64 * _MIB))
        if bigger > vmem_limit:
            vmem_limit = bigger
            tile_n = _rows_for(vmem_limit)

    n_pad = -(-n // 8) * 8
    tile_n = min(tile_n, n_pad)                    # don't exceed the array
    num_tiles = -(-n // tile_n)
    last_valid = n - (num_tiles - 1) * tile_n
    rem = 0 if last_valid == tile_n else last_valid

    scale = float(-alpha) / float(n)               # fold alpha and 1/N

    kernel = functools.partial(
        _focal_loss_kernel, scale=scale, gamma=gamma, tile_n=tile_n, rem=rem
    )

    partial_sums = pl.pallas_call(
        kernel,
        out_shape=jax.ShapeDtypeStruct((num_tiles, 1), jnp.float32),
        grid_spec=pltpu.PrefetchScalarGridSpec(
            num_scalar_prefetch=0,
            grid=(num_tiles,),
            in_specs=[
                pl.BlockSpec((tile_n, c), lambda i: (i, 0)),
                pl.BlockSpec((tile_n, 1), lambda i: (i, 0)),
            ],
            out_specs=pl.BlockSpec(
                (1, 1), lambda i: (i, 0), memory_space=pltpu.SMEM
            ),
        ),
        compiler_params=pltpu.CompilerParams(
            dimension_semantics=("parallel",),
            vmem_limit_bytes=vmem_limit,
        ),
    )(embeddings, labels2d)

    if num_tiles == 1:
        return partial_sums[0, 0]
    return jnp.sum(partial_sums)


def _reference_focal_loss(embeddings, labels, gamma=GAMMA, alpha=ALPHA):
    logp = jax.nn.log_softmax(embeddings.astype(jnp.float32), axis=-1)
    logpt = jnp.take_along_axis(logp, labels[:, None].astype(jnp.int32), axis=-1)
    pt = jnp.exp(logpt)
    return jnp.mean(-alpha * (1.0 - pt) ** gamma * logpt)


if __name__ == "__main__":
    key = jax.random.PRNGKey(0)
    k_emb, k_lab, k_emb2, k_lab2 = jax.random.split(key, 4)

    # Small shapes consistent with the module: 16 samples, 32 classes.
    N, C = 16, 32
    embeddings = jax.random.normal(k_emb, (N, C), dtype=jnp.float32)
    labels = jax.random.randint(k_lab, (N,), 0, C, dtype=jnp.int32)

    loss = jax.block_until_ready(focal_loss(embeddings, labels))
    ref = _reference_focal_loss(embeddings, labels)
    assert jnp.allclose(loss, ref, rtol=1e-5, atol=1e-5), (loss, ref)

    # Remainder case: N not a multiple of 8 (exercises the pl.when-gated
    # last-tile masking and the zeroing of overhanging logits).
    N2 = 20
    embeddings2 = jax.random.normal(k_emb2, (N2, C), dtype=jnp.float32)
    labels2 = jax.random.randint(k_lab2, (N2,), 0, C, dtype=jnp.int32)
    loss2 = jax.block_until_ready(focal_loss(embeddings2, labels2))
    ref2 = _reference_focal_loss(embeddings2, labels2)
    assert jnp.allclose(loss2, ref2, rtol=1e-5, atol=1e-5), (loss2, ref2)

    print("KERNEL_OK")
</pallas_src>

<mosaic_0001>
module attributes {stable_mosaic.version = 11 : i64} {
  func.func @_focal_loss_kernel(%arg0: i32, %arg1: memref<16x32xf32, #tpu.memory_space<vmem>>, %arg2: memref<16x1xi32, #tpu.memory_space<vmem>>, %arg3: memref<1x1xf32, #tpu.memory_space<smem>>) attributes {dimension_semantics = [#tpu.dimension_semantics<parallel>], iteration_bounds = array<i64: 1>, scalar_prefetch = 0 : i64, scratch_operands = 0 : i64, tpu.core_type = #tpu.core_type<tc>, window_params = [{transform_indices = @transform_0, window_bounds = array<i64: 16, 32>}, {transform_indices = @transform_1, window_bounds = array<i64: 16, 1>}, {transform_indices = @transform_2, window_bounds = array<i64: 1, 1>}]} {
    %c0 = arith.constant 0 : index
    %c0_0 = arith.constant 0 : index
    %0 = vector.load %arg1[%c0, %c0_0] : memref<16x32xf32, #tpu.memory_space<vmem>>, vector<16x32xf32>
    %c0_1 = arith.constant 0 : index
    %c0_2 = arith.constant 0 : index
    %1 = vector.load %arg2[%c0_1, %c0_2] : memref<16x1xi32, #tpu.memory_space<vmem>>, vector<16x1xi32>
    %cst = arith.constant dense<0xFF800000> : vector<16xf32>
    %2 = vector.multi_reduction <maximumf>, %0, %cst [1] : vector<16x32xf32> to vector<16xf32>
    %3 = vector.shape_cast %2 : vector<16xf32> to vector<16x1xf32>
    %4 = vector.broadcast %3 : vector<16x1xf32> to vector<16x32xf32>
    %5 = arith.subf %0, %4 : vector<16x32xf32>
    %6 = math.exp %5 : vector<16x32xf32>
    %cst_3 = arith.constant dense<0.000000e+00> : vector<16xf32>
    %7 = vector.multi_reduction <add>, %6, %cst_3 [1] : vector<16x32xf32> to vector<16xf32>
    %8 = vector.shape_cast %7 : vector<16xf32> to vector<16x1xf32>
    %9 = math.log %8 : vector<16x1xf32>
    %10 = tpu.iota {dimensions = array<i32: 1>} : vector<16x32xi32>
    %11 = vector.broadcast %1 : vector<16x1xi32> to vector<16x32xi32>
    %12 = arith.cmpi eq, %10, %11 : vector<16x32xi32>
    %cst_4 = arith.constant 0.000000e+00 : f32
    %13 = vector.broadcast %cst_4 : f32 to vector<16x32xf32>
    %14 = arith.select %12, %5, %13 : vector<16x32xi1>, vector<16x32xf32>
    %cst_5 = arith.constant dense<0.000000e+00> : vector<16xf32>
    %15 = vector.multi_reduction <add>, %14, %cst_5 [1] : vector<16x32xf32> to vector<16xf32>
    %16 = vector.shape_cast %15 : vector<16xf32> to vector<16x1xf32>
    %17 = arith.subf %16, %9 : vector<16x1xf32>
    %18 = math.exp %17 : vector<16x1xf32>
    %cst_6 = arith.constant 1.000000e+00 : f32
    %19 = vector.broadcast %cst_6 : f32 to vector<16x1xf32>
    %20 = arith.subf %19, %18 : vector<16x1xf32>
    %21 = arith.mulf %20, %20 : vector<16x1xf32>
    %22 = arith.mulf %21, %17 : vector<16x1xf32>
    %23 = vector.shape_cast %22 : vector<16x1xf32> to vector<1x16x1xf32>
    %cst_7 = arith.constant dense<0.000000e+00> : vector<1xf32>
    %24 = vector.multi_reduction <add>, %23, %cst_7 [1, 2] : vector<1x16x1xf32> to vector<1xf32>
    %25 = vector.shape_cast %24 : vector<1xf32> to vector<1x1x1xf32>
    %26 = vector.extract %25[0, 0, 0] : f32 from vector<1x1x1xf32>
    %cst_8 = arith.constant -1.562500e-02 : f32
    %27 = arith.mulf %cst_8, %26 : f32
    %c0_9 = arith.constant 0 : index
    %c0_10 = arith.constant 0 : index
    %28 = memref.load %arg3[%c0_9, %c0_10] : memref<1x1xf32, #tpu.memory_space<smem>>
    memref.store %27, %arg3[%c0_9, %c0_10] : memref<1x1xf32, #tpu.memory_space<smem>>
    return
  }
  func.func @transform_0(%arg0: i32) -> (i32, i32) {
    %c0_i32 = arith.constant 0 : i32
    %c0_i32_0 = arith.constant 0 : i32
    return %arg0, %c0_i32 : i32, i32
  }
  func.func @transform_1(%arg0: i32) -> (i32, i32) {
    %c0_i32 = arith.constant 0 : i32
    %c0_i32_0 = arith.constant 0 : i32
    return %arg0, %c0_i32 : i32, i32
  }
  func.func @transform_2(%arg0: i32) -> (i32, i32) {
    %c0_i32 = arith.constant 0 : i32
    %c0_i32_0 = arith.constant 0 : i32
    return %arg0, %c0_i32 : i32, i32
  }
}

</mosaic_0001>

<bundles_post_ra>
// kernel: tpu_custom_call.1
= control target key start
LH: loop header
LB: loop body
LE: loop exit
PB: predicated region body
PF: predicated region fallthrough
CT: control target
= control target key end

     0   :  { %vm16_vm0 = vcmask 261120   ;;  %v126_v4 = vmov 0   ;;  %s164_s0 = inlined_call_operand.vmem [shape: f32[16,32], index: 0, kind: input, shape index: {}]   ;;  %s165_s1 = inlined_call_operand.vmem [shape: s32[16,1], index: 1, kind: input, shape index: {}]   ;;  %s166_s2 = inlined_call_operand.hbm [shape: f32[1,1], index: 2, kind: output, shape index: {}]  }
   0x1   :  { %v12_v0 = vld [vmem:[%s164_s0] sm:$0xff]  ;;  %v13_v1 = vld [vmem:[%s164_s0 + $0x8] sm:$0xff]  ;;  %102 = vset.pattern.permute.xlu1 %v126_v4  ;;  %103 = vset.pattern.permute.xlu0 %v126_v4 }
   0x2   :  { %v14_v2 = vld [vmem:[%s165_s1] sm:$0xff]  ;;  %v17_v3 = vsel %vm16_vm0, %v12_v0, -inf }
   0x3   :  { %7 = vsyncpa [#allocation3], 0  ;;  %18 = vmax.xlane.f32.xlu0 %v17_v3  ;;  %42 = vperm.xlu1 %102, %v14_v2   ;;  %v20_v5 = vsel %vm16_vm0, %v13_v1, -inf  ;;  %v15_v6 = vld [vmem:[%s165_s1 + $0x8] sm:$0xff]  ;;  %v39_v13 = vlaneseq  ;;  %vm69_vm3 = vcmask 7168   ;;  %s127_s17 = smov [#allocation2]  }
   0x5   :  { %v40_v15 = vand.u32 127, %v39_v13 }
   0x7   :  { %21 = vmax.xlane.f32.xlu0 %v20_v5  ;;  %45 = vperm.xlu1 %102, %v15_v6  }
  0x7e   :  { %v43_v14 = vpop.permute.xlu1 %42 }
  0x7f   :  { %vm47_vm1 = vcmp.eq.s32.totalorder %v40_v15, %v43_v14 }
  0x82   :  { %v46_v17 = vpop.permute.xlu1 %45 }
  0x83   :  { %vm48_vm2 = vcmp.eq.s32.totalorder %v40_v15, %v46_v17 }
  0x8c   :  { %v19_v7 = vpop.xlane.xlu0 %18 }
  0x8d   :  { %v23_v8 = vsub.f32 %v12_v0, %v19_v7 }
  0x8f   :  { %v25_v9 = vmul.f32 1.442695, %v23_v8  ;;  %v49_v19 = vsel %vm47_vm1, %v23_v8, 0.0 }
  0x90   :  { %v22_v10 = vpop.xlane.xlu0 %21  ;;  %v51_v21 = vsel %vm16_vm0, %v49_v19, 0.0 }
  0x91   :  { %104 = vpow2.f32 %v25_v9  ;;  %v24_v11 = vsub.f32 %v13_v1, %v22_v10 }
  0x93   :  { %v27_v12 = vmul.f32 1.442695, %v24_v11  ;;  %v50_v23 = vsel %vm48_vm2, %v24_v11, 0.0 }
  0x94   :  { %v54_v24 = vsel %vm16_vm0, %v50_v23, 0.0 }
  0x95   :  { %106 = vpow2.f32 %v27_v12 }
  0x9e   :  { %v105_v16 = vpop.eup %104 }
  0x9f   :  { %v29_v18 = vsel %vm16_vm0, %v105_v16, 0.0 }
  0xa0   :  { %30 = vadd.xlane.f32.xlu0 %v29_v18 }
  0xa2   :  { %v107_v20 = vpop.eup %106 }
  0xa3   :  { %v32_v22 = vsel %vm16_vm0, %v107_v20, 0.0 }
  0xa4   :  { %52 = vadd.xlane.f32.xlu0 %v51_v21  ;;  %33 = vadd.xlane.f32.xlu1 %v32_v22 }
  0xa8   :  { %55 = vadd.xlane.f32.xlu0 %v54_v24 }
 0x129   :  { %v31_v25 = vpop.xlane.xlu0 %30 }
 0x12a   :  { %108 = vlog2.f32 %v31_v25 }
 0x12d   :  { %v34_v26 = vpop.xlane.xlu1 %33  ;;  %v53_v28 = vpop.xlane.xlu0 %52 }
 0x12e   :  { %110 = vlog2.f32 %v34_v26 }
 0x131   :  { %v56_v34 = vpop.xlane.xlu0 %55 }
 0x137   :  { %v109_v27 = vpop.eup %108 }
 0x138   :  { %v36_v29 = vmul.f32 0.6931472, %v109_v27 }
 0x13a   :  { %v57_v30 = vsub.f32 %v53_v28, %v36_v29 }
 0x13b   :  { %v111_v31 = vpop.eup %110 }
 0x13c   :  { %v59_v32 = vmul.f32 1.442695, %v57_v30  ;;  %v38_v33 = vmul.f32 0.6931472, %v111_v31 }
 0x13e   :  { %112 = vpow2.f32 %v59_v32  ;;  %v58_v35 = vsub.f32 %v56_v34, %v38_v33 }
 0x140   :  { %v61_v36 = vmul.f32 1.442695, %v58_v35 }
 0x142   :  { %114 = vpow2.f32 %v61_v36 }
 0x14b   :  { %v113_v37 = vpop.eup %112 }
 0x14c   :  { %v63_v38 = vsub.f32 1.0, %v113_v37 }
 0x14e   :  { %v65_v39 = vmul.f32 %v63_v38, %v63_v38 }
 0x14f   :  { %v115_v40 = vpop.eup %114 }
 0x150   :  { %v64_v41 = vsub.f32 1.0, %v115_v40  ;;  %v67_v42 = vmul.f32 %v65_v39, %v57_v30 }
 0x152   :  { %v66_v43 = vmul.f32 %v64_v41, %v64_v41  ;;  %v70_v45 = vsel %vm69_vm3, %v67_v42, 0.0 }
 0x154   :  { %v68_v44 = vmul.f32 %v66_v43, %v58_v35 }
 0x156   :  { %v71_v46 = vsel %vm69_vm3, %v68_v44, 0.0 }
 0x157   :  { %v72_v47 = vadd.f32 %v71_v46, %v70_v45 }
 0x159   :  { %73 = vadd.xlane.f32.xlu0 %v72_v47 }
 0x1e2   :  { %v74_v48 = vpop.xlane.xlu0 %73 }
 0x1e3   :  { %v75_v49 = vrot.slane %v74_v48, 4 }
 0x1e5   :  { %v76_v50 = vadd.f32 %v75_v49, %v74_v48 }
 0x1e7   :  { %v77_v51 = vrot.slane %v76_v50, 2 }
 0x1e9   :  { %v78_v52 = vadd.f32 %v77_v51, %v76_v50 }
 0x1eb   :  { %v79_v53 = vrot.slane %v78_v52, 1 }
 0x1ed   :  { %v80_v54 = vadd.f32 %v79_v53, %v78_v52 }
 0x1ef   :  { %98 = vpush %v80_v54 }
 0x220   :  { %s99_s0 = spop %98 }
 0x221   :  { %s82_s1 = smul.f32 -0.015625, %s99_s0 }
 0x223   :  { %84 = sst [smem:[#allocation2]] %s82_s1 }
 0x224   :  { %92 = dma.smem_to_hbm %s127_s17, 16, %s166_s2, [#allocation3]  }
 0x225   :  { %124 = dma.done.wait [#allocation3], 16  }
 0x226   :  { %125 = vsyncadd [#allocation3], 4294967280 }
 0x227   :  { %96 = sfence }
 0x228   :  { %97 = vsyncpa [#allocation3], 1 }

</bundles_post_ra>
